<compile_context>
chip_gen: v7x
topology: tpu7x:2x2x1
jax: 0.10.0
libtpu: 0.0.40
codegen_flags: <defaults>
</compile_context>

<pallas_src>
import math

import jax
import jax.numpy as jnp
from jax.experimental import pallas as pl
from jax.experimental.pallas import tpu as pltpu

_LANE = 128
_SUBLANE = 8
_ROW_TILE = 256                      # row / contraction tile for large N
_VMEM_LIMIT = 48 * 1024 * 1024       # stays under v7x's 64 MiB physical VMEM


def _round_up(x, m):
    return ((x + m - 1) // m) * m


def _agg_project_kernel(adj_ref, x_ref, w_ref, b_ref, o_ref, acc_ref):
    """out[i] = (sum_k adj[i,k] @ x[k]) @ W + b   (used when F_in <= F_out_p)."""
    k = pl.program_id(1)

    @pl.when(k == 0)
    def _():
        acc_ref[...] = jnp.zeros_like(acc_ref)

    # N^2-sized matmul runs at the *narrow* width F_in (re-associated form).
    acc_ref[...] += jnp.dot(adj_ref[...], x_ref[...],
                            preferred_element_type=jnp.float32)

    @pl.when(k == pl.num_programs(1) - 1)
    def _():
        out = jnp.dot(acc_ref[...], w_ref[...],
                      preferred_element_type=jnp.float32) + b_ref[...]
        o_ref[...] = out.astype(o_ref.dtype)


def _agg_bias_kernel(adj_ref, s_ref, b_ref, o_ref, acc_ref):
    """out[i] = (sum_k adj[i,k] @ support[k]) + b   (used when F_in > F_out_p)."""
    k = pl.program_id(1)

    @pl.when(k == 0)
    def _():
        acc_ref[...] = jnp.zeros_like(acc_ref)

    acc_ref[...] += jnp.dot(adj_ref[...], s_ref[...],
                            preferred_element_type=jnp.float32)

    @pl.when(k == pl.num_programs(1) - 1)
    def _():
        o_ref[...] = (acc_ref[...] + b_ref[...]).astype(o_ref.dtype)


def _project_kernel(x_ref, w_ref, o_ref):
    """support[i] = x[i] @ W  (row-tiled; full F_in contraction per step)."""
    o_ref[...] = jnp.dot(x_ref[...], w_ref[...],
                         preferred_element_type=jnp.float32).astype(o_ref.dtype)


def dyconv(x, adj, weight, bias=None, *, row_tile=_ROW_TILE):
    """x: [N, F_in], adj: [N, N], weight: [F_in, F_out], bias: [F_out]."""
    n, f_in = x.shape
    f_in_w, f_out = weight.shape
    assert f_in_w == f_in and adj.shape == (n, n)
    dtype = x.dtype

    # Pad the output feature dim to a lane-dense multiple of 128 so the HBM
    # store of the result is unmasked; padded columns are sliced off below.
    f_out_p = _round_up(f_out, _LANE)

    # Row / contraction tiling over N: one full block for small graphs,
    # 256-wide tiles (multiple of 8 sublanes / 128 lanes) otherwise.
    if n <= row_tile:
        n_p = _round_up(n, _SUBLANE)
        tm = tk = n_p
    else:
        n_p = _round_up(n, row_tile)
        tm = tk = row_tile

    if bias is None:
        bias = jnp.zeros((f_out,), dtype)
    w_p = jnp.pad(weight, ((0, 0), (0, f_out_p - f_out))).astype(dtype)
    b_p = jnp.pad(bias, (0, f_out_p - f_out)).reshape(1, f_out_p).astype(dtype)
    x_p = jnp.pad(x, ((0, n_p - n), (0, 0)))
    adj_p = jnp.pad(adj, ((0, n_p - n), (0, n_p - n)))

    grid = (n_p // tm, n_p // tk)
    cparams = pltpu.CompilerParams(
        dimension_semantics=("parallel", "arbitrary"),
        vmem_limit_bytes=_VMEM_LIMIT)
    adj_spec = pl.BlockSpec((tm, tk), lambda i, k: (i, k))
    bias_spec = pl.BlockSpec((1, f_out_p), lambda i, k: (0, 0))   # VMEM-resident
    out_spec = pl.BlockSpec((tm, f_out_p), lambda i, k: (i, 0))
    out_shape = jax.ShapeDtypeStruct((n_p, f_out_p), dtype)

    if f_in <= f_out_p:
        # Re-associated fused form: (adj @ x) @ W + b.
        out_p = pl.pallas_call(
            _agg_project_kernel,
            out_shape=out_shape,
            grid_spec=pltpu.PrefetchScalarGridSpec(
                num_scalar_prefetch=0,
                grid=grid,
                in_specs=[
                    adj_spec,
                    pl.BlockSpec((tk, f_in), lambda i, k: (k, 0)),
                    pl.BlockSpec((f_in, f_out_p), lambda i, k: (0, 0)),
                    bias_spec,
                ],
                out_specs=out_spec,
                scratch_shapes=[pltpu.VMEM((tm, f_in), jnp.float32)],
            ),
            compiler_params=cparams,
        )(adj_p, x_p, w_p, b_p)
    else:
        # Standard form: precompute support = x @ W once (row-tiled), then
        # aggregate adj @ support + b at the narrower width F_out_p.
        support = pl.pallas_call(
            _project_kernel,
            out_shape=jax.ShapeDtypeStruct((n_p, f_out_p), dtype),
            grid_spec=pltpu.PrefetchScalarGridSpec(
                num_scalar_prefetch=0,
                grid=(n_p // tm,),
                in_specs=[
                    pl.BlockSpec((tm, f_in), lambda i: (i, 0)),
                    pl.BlockSpec((f_in, f_out_p), lambda i: (0, 0)),
                ],
                out_specs=pl.BlockSpec((tm, f_out_p), lambda i: (i, 0)),
            ),
            compiler_params=pltpu.CompilerParams(
                dimension_semantics=("parallel",),
                vmem_limit_bytes=_VMEM_LIMIT),
        )(x_p, w_p)

        out_p = pl.pallas_call(
            _agg_bias_kernel,
            out_shape=out_shape,
            grid_spec=pltpu.PrefetchScalarGridSpec(
                num_scalar_prefetch=0,
                grid=grid,
                in_specs=[
                    adj_spec,
                    pl.BlockSpec((tk, f_out_p), lambda i, k: (k, 0)),
                    bias_spec,
                ],
                out_specs=out_spec,
                scratch_shapes=[pltpu.VMEM((tm, f_out_p), jnp.float32)],
            ),
            compiler_params=cparams,
        )(adj_p, support, b_p)

    return out_p[:n, :f_out]


if __name__ == "__main__":
    def reference(x, adj, w, b):
        return adj @ (x @ w) + b

    def init_params(key, f_in, f_out):
        # Mirrors reset_parameters(): stdv = 1/sqrt(out_features), U(-stdv, stdv).
        kw, kb = jax.random.split(key)
        stdv = 1.0 / math.sqrt(f_out)
        w = jax.random.uniform(kw, (f_in, f_out), jnp.float32, -stdv, stdv)
        b = jax.random.uniform(kb, (f_out,), jnp.float32, -stdv, stdv)
        return w, b

    key = jax.random.PRNGKey(0)
    cases = [
        (8, 16, 32),     # tiny toy case: re-associated path, single block
        (100, 24, 40),   # single block with row padding (100 -> 104)
        (512, 24, 136),  # tiled (2 x 2) grid, f_out padded 136 -> 256
        (384, 160, 96),  # F_in > F_out_p: standard path w/ precomputed support
    ]
    for n, f_in, f_out in cases:
        key, kx, ka, kp = jax.random.split(key, 4)
        x = jax.random.normal(kx, (n, f_in), jnp.float32)
        adj_raw = jax.random.uniform(ka, (n, n), jnp.float32)
        adj = adj_raw / jnp.sum(adj_raw, axis=-1, keepdims=True)
        w, b = init_params(kp, f_in, f_out)

        out = dyconv(x, adj, w, b)
        jax.block_until_ready(out)

        ref = reference(x, adj, w, b)
        assert out.shape == (n, f_out)
        assert jnp.allclose(out, ref, atol=1e-4, rtol=1e-4), (
            f"mismatch at N={n}, F_in={f_in}, F_out={f_out}: "
            f"max abs err {jnp.max(jnp.abs(out - ref))}")

    print("KERNEL_OK")
</pallas_src>

<mosaic_0001>
module attributes {stable_mosaic.version = 11 : i64} {
  func.func @_agg_project_kernel(%arg0: i32, %arg1: i32, %arg2: memref<8x8xf32, #tpu.memory_space<vmem>>, %arg3: memref<8x16xf32, #tpu.memory_space<vmem>>, %arg4: memref<16x128xf32, #tpu.memory_space<vmem>>, %arg5: memref<1x128xf32, #tpu.memory_space<vmem>>, %arg6: memref<8x128xf32, #tpu.memory_space<vmem>>, %arg7: memref<8x16xf32, #tpu.memory_space<vmem>>) attributes {dimension_semantics = [#tpu.dimension_semantics<parallel>, #tpu.dimension_semantics<arbitrary>], iteration_bounds = array<i64: 1, 1>, scalar_prefetch = 0 : i64, scratch_operands = 1 : i64, tpu.core_type = #tpu.core_type<tc>, window_params = [{transform_indices = @transform_0, window_bounds = array<i64: 8, 8>}, {transform_indices = @transform_1, window_bounds = array<i64: 8, 16>}, {pipeline_mode = #tpu.pipeline_mode<synchronous>, transform_indices = @transform_2, window_bounds = array<i64: 16, 128>}, {pipeline_mode = #tpu.pipeline_mode<synchronous>, transform_indices = @transform_3, window_bounds = array<i64: 1, 128>}, {transform_indices = @transform_4, window_bounds = array<i64: 8, 128>}]} {
    %c0_i32 = arith.constant 0 : i32
    %0 = arith.cmpi eq, %arg1, %c0_i32 : i32
    %1 = arith.extui %0 : i1 to i32
    %c0_i32_0 = arith.constant 0 : i32
    %2 = arith.cmpi ne, %1, %c0_i32_0 : i32
    scf.if %2 {
      %cst_10 = arith.constant 0.000000e+00 : f32
      %12 = vector.broadcast %cst_10 : f32 to vector<8x16xf32>
      %c0_11 = arith.constant 0 : index
      %c0_12 = arith.constant 0 : index
      %13 = vector.load %arg7[%c0_11, %c0_12] : memref<8x16xf32, #tpu.memory_space<vmem>>, vector<8x16xf32>
      tpu.vector_store %arg7[%c0_11, %c0_12], %12 {strides = array<i32>} : memref<8x16xf32, #tpu.memory_space<vmem>>, vector<8x16xf32>,
    } else {
    }
    %c0 = arith.constant 0 : index
    %c0_1 = arith.constant 0 : index
    %3 = vector.load %arg7[%c0, %c0_1] : memref<8x16xf32, #tpu.memory_space<vmem>>, vector<8x16xf32>
    %c0_2 = arith.constant 0 : index
    %c0_3 = arith.constant 0 : index
    %4 = vector.load %arg2[%c0_2, %c0_3] : memref<8x8xf32, #tpu.memory_space<vmem>>, vector<8x8xf32>
    %c0_4 = arith.constant 0 : index
    %c0_5 = arith.constant 0 : index
    %5 = vector.load %arg3[%c0_4, %c0_5] : memref<8x16xf32, #tpu.memory_space<vmem>>, vector<8x16xf32>
    %cst = arith.constant dense<0.000000e+00> : vector<8x16xf32>
    %6 = tpu.matmul %4, %5, %cst {dimension_numbers = #tpu.dot_dimension_numbers<[1], [0], [0], [1], [0, 0, 1, 1], [], []>} : vector<8x8xf32>, vector<8x16xf32>, vector<8x16xf32> -> vector<8x16xf32>
    %7 = arith.addf %3, %6 : vector<8x16xf32>
    %c0_6 = arith.constant 0 : index
    %c0_7 = arith.constant 0 : index
    %8 = vector.load %arg7[%c0_6, %c0_7] : memref<8x16xf32, #tpu.memory_space<vmem>>, vector<8x16xf32>
    tpu.vector_store %arg7[%c0_6, %c0_7], %7 {strides = array<i32>} : memref<8x16xf32, #tpu.memory_space<vmem>>, vector<8x16xf32>,
    %c0_i32_8 = arith.constant 0 : i32
    %9 = arith.cmpi eq, %arg1, %c0_i32_8 : i32
    %10 = arith.extui %9 : i1 to i32
    %c0_i32_9 = arith.constant 0 : i32
    %11 = arith.cmpi ne, %10, %c0_i32_9 : i32
    scf.if %11 {
      %c0_10 = arith.constant 0 : index
      %c0_11 = arith.constant 0 : index
      %12 = vector.load %arg7[%c0_10, %c0_11] : memref<8x16xf32, #tpu.memory_space<vmem>>, vector<8x16xf32>
      %c0_12 = arith.constant 0 : index
      %c0_13 = arith.constant 0 : index
      %13 = vector.load %arg4[%c0_12, %c0_13] : memref<16x128xf32, #tpu.memory_space<vmem>>, vector<16x128xf32>
      %cst_14 = arith.constant dense<0.000000e+00> : vector<8x128xf32>
      %14 = tpu.matmul %12, %13, %cst_14 {dimension_numbers = #tpu.dot_dimension_numbers<[1], [0], [0], [1], [0, 0, 1, 1], [], []>} : vector<8x16xf32>, vector<16x128xf32>, vector<8x128xf32> -> vector<8x128xf32>
      %c0_15 = arith.constant 0 : index
      %c0_16 = arith.constant 0 : index
      %15 = vector.load %arg5[%c0_15, %c0_16] : memref<1x128xf32, #tpu.memory_space<vmem>>, vector<1x128xf32>
      %16 = vector.broadcast %15 : vector<1x128xf32> to vector<8x128xf32>
      %17 = arith.addf %14, %16 : vector<8x128xf32>
      %c0_17 = arith.constant 0 : index
      %c0_18 = arith.constant 0 : index
      %18 = vector.load %arg6[%c0_17, %c0_18] : memref<8x128xf32, #tpu.memory_space<vmem>>, vector<8x128xf32>
      tpu.vector_store %arg6[%c0_17, %c0_18], %17 {strides = array<i32>} : memref<8x128xf32, #tpu.memory_space<vmem>>, vector<8x128xf32>,
    } else {
    }
    return
  }
  func.func @transform_0(%arg0: i32, %arg1: i32) -> (i32, i32) {
    %c0_i32 = arith.constant 0 : i32
    return %arg0, %arg1 : i32, i32
  }
  func.func @transform_1(%arg0: i32, %arg1: i32) -> (i32, i32) {
    %c0_i32 = arith.constant 0 : i32
    %c0_i32_0 = arith.constant 0 : i32
    return %arg1, %c0_i32 : i32, i32
  }
  func.func @transform_2(%arg0: i32, %arg1: i32) -> (i32, i32) {
    %c0_i32 = arith.constant 0 : i32
    %c0_i32_0 = arith.constant 0 : i32
    %c0_i32_1 = arith.constant 0 : i32
    return %c0_i32, %c0_i32_0 : i32, i32
  }
  func.func @transform_3(%arg0: i32, %arg1: i32) -> (i32, i32) {
    %c0_i32 = arith.constant 0 : i32
    %c0_i32_0 = arith.constant 0 : i32
    %c0_i32_1 = arith.constant 0 : i32
    return %c0_i32, %c0_i32_0 : i32, i32
  }
  func.func @transform_4(%arg0: i32, %arg1: i32) -> (i32, i32) {
    %c0_i32 = arith.constant 0 : i32
    %c0_i32_0 = arith.constant 0 : i32
    return %arg0, %c0_i32 : i32, i32
  }
}

</mosaic_0001>

<bundles_post_ra>
// kernel: tpu_custom_call.1
= control target key start
LH: loop header
LB: loop body
LE: loop exit
PB: predicated region body
PF: predicated region fallthrough
CT: control target
= control target key end

     0   :  { %9 = vsyncpa [#allocation4], 0  ;;  %s458_s0 = inlined_call_operand.hbm [shape: f32[8,8], index: 0, kind: input, shape index: {}]   ;;  %s459_s1 = inlined_call_operand.hbm [shape: f32[8,16], index: 1, kind: input, shape index: {}]   ;;  %s460_s2 = inlined_call_operand.hbm [shape: f32[16,128], index: 2, kind: input, shape index: {}]   ;;  %s461_s3 = inlined_call_operand.vmem [shape: f32[1,128], index: 3, kind: input, shape index: {}]   ;;  %s462_s4 = inlined_call_operand.hbm [shape: f32[8,128], index: 4, kind: output, shape index: {}]  }
   0x1   :  { %10 = vsyncpa [#allocation7], 0 }
   0x2   :  { %11 = vsyncpa [#allocation5], 0  ;;  %s370_s15 = smov [#allocation6]   ;;  %s371_s17 = smov [#allocation3]  }
   0x3   :  { %s28_s16 = sshll.u32 %s370_s15, 4  ;;  %s18_s18 = sshll.u32 %s371_s17, 4  ;;  %s29_s16 = int_to_ptr.vmem [resolvable:$true] %s28_s16  ;;  %s19_s18 = int_to_ptr.vmem [resolvable:$true] %s18_s18 }
   0x4   :  { %s276_s21 = scalar_lea.hbm %s459_s1, 128 }
   0x5   :  { %p277_p0 = scmp.ne.s32.totalorder %s459_s1, %s276_s21  ;;  %p280_p1 = scmp.lt.u32.totalorder %s276_s21, %s459_s1 }
   0x7   :  { %p282_p2 = pnand %p280_p1, %p277_p0 }
   0x9   :  { %285 = shalt.err (!%p282_p2)
}
   0xa   :  { %s286_s26 = scalar_lea.vmem %s29_s16, 128  ;;  %p291_p4 = scmp.lt.s32.totalorder %s29_s16, %s29_s16 }
   0xb   :  { %p287_p3 = scmp.ne.s32.totalorder %s29_s16, %s286_s26  ;;  %p292_p5 = scmp.lt.s32.totalorder %s286_s26, %s286_s26 }
   0xd   :  { %p293_p6 = por %p292_p5, %p291_p4 }
   0xf   :  { %p294_p7 = pnand %p293_p6, %p287_p3 }
  0x11   :  { %297 = shalt.err (!%p294_p7)
}
  0x12   :  { %31 = dma.hbm_to_vmem [thread:$0]  %s459_s1, 128, %s29_s16, [#allocation7]  }
  0x13   :  { %s298_s5 = scalar_lea.hbm %s458_s0, 128 }
  0x14   :  { %p299_p8 = scmp.ne.s32.totalorder %s458_s0, %s298_s5  ;;  %p302_p9 = scmp.lt.u32.totalorder %s298_s5, %s458_s0 }
  0x16   :  { %p304_p10 = pnand %p302_p9, %p299_p8 }
  0x18   :  { %307 = shalt.err (!%p304_p10)
}
  0x19   :  { %s308_s10 = scalar_lea.vmem %s19_s18, 128  ;;  %p313_p12 = scmp.lt.s32.totalorder %s19_s18, %s19_s18 }
  0x1a   :  { %p309_p11 = scmp.ne.s32.totalorder %s19_s18, %s308_s10  ;;  %p314_p13 = scmp.lt.s32.totalorder %s308_s10, %s308_s10 }
  0x1c   :  { %p315_p0 = por %p314_p13, %p313_p12 }
  0x1e   :  { %p316_p1 = pnand %p315_p0, %p309_p11 }
  0x20   :  { %319 = shalt.err (!%p316_p1)
}
  0x21   :  { %21 = dma.hbm_to_vmem [thread:$0]  %s458_s0, 128, %s19_s18, [#allocation4]  }
  0x22   :  { %s372_s12 = smov [#allocation8]   ;;  %s320_s16 = scalar_lea.hbm %s460_s2, 256 }
  0x23   :  { %s37_s13 = sshll.u32 %s372_s12, 4  ;;  %p321_p2 = scmp.ne.s32.totalorder %s460_s2, %s320_s16  ;;  %s38_s13 = int_to_ptr.vmem [resolvable:$true] %s37_s13 }
  0x24   :  { %p324_p3 = scmp.lt.u32.totalorder %s320_s16, %s460_s2 }
  0x26   :  { %p326_p4 = pnand %p324_p3, %p321_p2 }
  0x28   :  { %329 = shalt.err (!%p326_p4)
}
  0x29   :  { %s330_s22 = scalar_lea.vmem %s38_s13, 256  ;;  %p335_p6 = scmp.lt.s32.totalorder %s38_s13, %s38_s13 }
  0x2a   :  { %p331_p5 = scmp.ne.s32.totalorder %s38_s13, %s330_s22  ;;  %p336_p7 = scmp.lt.s32.totalorder %s330_s22, %s330_s22 }
  0x2c   :  { %p337_p8 = por %p336_p7, %p335_p6 }
  0x2e   :  { %p338_p9 = pnand %p337_p8, %p331_p5 }
  0x30   :  { %341 = shalt.err (!%p338_p9)
}
  0x31   :  { %s373_s0 = smov 128   ;;  %s374_s18 = smov 8  }
  0x32   :  { %43 = dma.hbm_to_vmem [thread:$0]  %s460_s2, 256, %s38_s13, [#allocation7], %s373_s0, %s373_s0, %s374_s18  }
  0x33   :  { %364 = dma.done.wait [#allocation4], 128  }
  0x34   :  { %365 = vsyncadd [#allocation4], 4294967168 }
  0x35   :  { %366 = dma.done.wait [#allocation7], 384  }
  0x36   :  { %367 = vsyncadd [#allocation7], 4294966912  ;;  %vm59_vm0 = vcmask 130048   ;;  %v375_v0 = vmov 0.0   ;;  %vm376_vm1 = vmmov 0   ;;  %vm64_vm2 = vcmask 64512  }
  0x37   :  { %252 = vmatprep.subr.mxu0 %v375_v0  ;;  %254 = vmatprep.mubr.msk.f32.mxu0 %vm376_vm1, %v375_v0  ;;  %60 = vst.msk [vmem:[#allocation2] sm:$0xff] %vm59_vm0, %v375_v0  ;;  %v63_v1 = vld [vmem:[#allocation6] sm:$0xff]  ;;  %v62_v2 = vld [vmem:[#allocation3] sm:$0xff]  ;;  %v145_v3 = vld [vmem:[#allocation8] sm:$0xff]  ;;  %v377_v5 = vmov 0.0|0.0   ;;  %s378_s26 = smov [#allocation9]  }
  0x38   :  { %261 = vmatprep.mubr.msk.f32.mxu1 %vm376_vm1, %v375_v0  ;;  %253 = vmatpush3.msra.mxu0 %v63_v1  ;;  %v146_v4 = vld [vmem:[#allocation8 + $0x8] sm:$0xff]  ;;  %s234_s27 = sshll.u32 %s378_s26, 4  ;;  %s235_s27 = int_to_ptr.vmem [resolvable:$true] %s234_s27 }
  0x39   :  { %255 = vmatmul.mubr.msk.f32.vlgmr.msra.gmra.mrb[0].mxu0 %vm64_vm2, %v62_v2  ;;  %264 = vmatprep.subr.bf16.mxu1 %v377_v5  ;;  %v265_v6 = vpack.c.bf16 %v146_v4, %v145_v3  ;;  %v245_v12 = vld [vmem:[%s461_s3] ss:$0 sm:$0xff]  ;;  %s342_s28 = scalar_lea.vmem %s235_s27, 128  ;;  %p347_p11 = scmp.lt.s32.totalorder %s235_s27, %s235_s27 }
  0x3a   :  { %p343_p10 = scmp.ne.s32.totalorder %s235_s27, %s342_s28  ;;  %p348_p12 = scmp.lt.s32.totalorder %s342_s28, %s342_s28 }
  0x3b   :  { %266 = vmatpush3.bf16.msra.mxu1 %v265_v6 }
  0x3c   :  { %p349_p13 = por %p348_p12, %p347_p11 }
  0x3e   :  { %v61_v7 = vld [vmem:[#allocation2] sm:$0xff]  ;;  %p350_p0 = pnand %p349_p13, %p343_p10 }
 0x10c   :  { %v134_v8 = vpop.f32.mrb[0].mxu0 }
 0x10d   :  { %v138_v9 = vadd.f32 %v134_v8, %v61_v7  ;;  %v256_v10 = vpop.f32.mrb[1].mxu0 }
 0x10f   :  { %140 = vst.msk [vmem:[#allocation2] sm:$0xff] %vm59_vm0, %v138_v9 }
 0x116   :  { %v144_v11 = vld [vmem:[#allocation2] sm:$0xff] }
 0x117   :  { %262 = vmatmul.mubr.msk.f32.vlgmr.msra.gmra.mrb[0].mxu1 %vm59_vm0, %v144_v11 }
 0x1ea   :  { %v223_v13 = vpop.f32.mrb[0].mxu1 }
 0x1eb   :  { %v224_v14 = vadd.f32 %v245_v12, %v223_v13  ;;  %v263_v15 = vpop.f32.mrb[1].mxu1 }
 0x1ed   :  { %227 = vst [vmem:[#allocation9] sm:$0xff] %v224_v14 }
 0x1ee   :  { %353 = shalt.err (!%p350_p0)
}
 0x1ef   :  { %s354_s5 = scalar_lea.hbm %s462_s4, 128 }
 0x1f0   :  { %p355_p1 = scmp.ne.s32.totalorder %s462_s4, %s354_s5  ;;  %p358_p2 = scmp.lt.u32.totalorder %s354_s5, %s462_s4 }
 0x1f2   :  { %p360_p3 = pnand %p358_p2, %p355_p1 }
 0x1f4   :  { %363 = shalt.err (!%p360_p3)
}
 0x1f5   :  { %237 = dma.vmem_to_hbm [thread:$0]  %s235_s27, 128, %s462_s4, [#allocation5]  }
 0x1f6   :  { %368 = dma.done.wait [#allocation5], 128  }
 0x1f7   :  { %369 = vsyncadd [#allocation5], 4294967168 }
 0x1f8   :  { %241 = vsyncpa [#allocation4], 1 }
 0x1f9   :  { %242 = vsyncpa [#allocation7], 1 }
 0x1fa   :  { %243 = vsyncpa [#allocation5], 1 }

</bundles_post_ra>
